<compile_context>
chip_gen: v6e
topology: v6e:2x2x1
jax: 0.10.0
libtpu: 0.0.40
codegen_flags: <defaults>
</compile_context>

<pallas_src>
import math

import jax
import jax.numpy as jnp
import numpy as np
from jax import lax
from jax.experimental import pallas as pl
from jax.experimental.pallas import tpu as pltpu


# ----------------------------------------------------------------------------
# Fused kernel: encoder + correlation + decoder + match() post-processing.
# ----------------------------------------------------------------------------
def _make_fused_kernel(use_bf16_exp):
    def _fused_matcher_kernel(xq_ref, xs_ref, wt_ref, coord_ref, sim_ref, packed_ref):
        """Per grid step (one batch element x one query tile):

          xq_ref    : (1, C, TQ)   query pixels of this tile (channels-first, lane-dense)
          xs_ref    : (1, C, HW)   all support pixels
          wt_ref    : (CFEAT, C)   encoder weight (1/sqrt(CFEAT) scale pre-folded), transposed
          coord_ref : (8, HW)      bf16 support coords, rows [x, y, 1, 0,0,0,0,0]
          sim_ref   : (1, TQ, HW)  sim_matrix[q, s] tile (bf16)
          packed_ref: (1, 6, TQ)   rows [flow_x, flow_y, logit,
                                         clamp(flow_x), clamp(flow_y), sigmoid(logit)]
        """
        c_in = xq_ref.shape[1]
        xq = xq_ref[0]                       # (C, TQ)
        xs = xs_ref[0]                       # (C, HW)
        wt = wt_ref[...]                     # (CFEAT, C) f32

        # --- encoder: 1x1 conv as C broadcast VPU FMAs (K=3 would waste the MXU) ---
        fq = wt[:, 0:1] * xq[0:1, :]         # (CFEAT, TQ) channels-major, lane-dense
        fs = wt[:, 0:1] * xs[0:1, :]         # (CFEAT, HW)
        for c in range(1, c_in):             # static, tiny C -> unrolled
            fq = fq + wt[:, c:c + 1] * xq[c:c + 1, :]
            fs = fs + wt[:, c:c + 1] * xs[c:c + 1, :]

        fq_b = fq.astype(jnp.bfloat16)       # bf16 MXU operands, f32 accumulation
        fs_b = fs.astype(jnp.bfloat16)

        # --- single correlation matmul, contracting the feature axis (no explicit
        #     feature transposes, no duplicate HWxHW matmul) ---
        sim_sq = lax.dot_general(
            fs_b, fq_b, (((0,), (0,)), ((), ())),
            preferred_element_type=jnp.float32)           # (HWs, TQ), support-major

        # query-major bf16 copy for the sim_matrix output (cast BEFORE transpose)
        sim_ref[0] = jnp.transpose(sim_sq.astype(jnp.bfloat16))   # (TQ, HWs)

        # --- decoder: softmax over support pixels (sublane axis) + soft-argmax ---
        m = jnp.max(sim_sq, axis=0, keepdims=True)        # (1, TQ)  certainty logit
        if use_bf16_exp:
            # bf16 EUP on v6e / v7x: ~2x exp throughput, p already MXU-ready.
            p_b = jnp.exp((sim_sq - m).astype(jnp.bfloat16))
        else:
            # v5e (or unknown chip): f32 EUP, cast afterwards.
            p_b = jnp.exp(sim_sq - m).astype(jnp.bfloat16)

        # coord rows [x, y, 1, 0...]: one bf16 MXU dot yields Sum x*p, Sum y*p, Sum p.
        acc = jnp.dot(coord_ref[...], p_b,
                      preferred_element_type=jnp.float32)  # (8, TQ)
        inv = pl.reciprocal(acc[2:3, :], approx=True)       # EUP vrcp on Sum p
        flow = acc[0:2, :] * inv                             # (2, TQ)

        # --- match() post-processing, fused ---
        flow_c = jnp.clip(flow, -1.0, 1.0)                   # torch.clamp(qts, -1, 1)
        cert = pl.reciprocal(1.0 + jnp.exp(-m))              # .sigmoid() (exact recip)

        packed_ref[0, 0:2, :] = flow                         # dense_flow (x, y)
        packed_ref[0, 2:3, :] = m                            # dense_certainty logit
        packed_ref[0, 3:5, :] = flow_c                       # clamped query_to_support
        packed_ref[0, 5:6, :] = cert                         # sigmoid(certainty)

    return _fused_matcher_kernel


def _use_bf16_exp():
    # bf16 EUP exists on v6e / v7x; v5e (and unknown chips) keep the f32 path.
    try:
        kind = jax.devices()[0].device_kind.lower()
    except Exception:
        return False
    return any(tag in kind for tag in ("v6", "v7", "trillium"))


def _pick_query_tile(hw):
    # Lane-aligned query tile that divides HW; prefer >= 2 tiles so both v7x
    # TensorCores get work even with batch 1, and the live set stays HW*TQ.
    for tq in (512, 256, 128):
        if tq <= hw // 2 and hw % tq == 0:
            return tq
    return hw  # full extent (always satisfies the block-shape constraint)


def fused_match(xq_flat, xs_flat, wt_enc, coords8):
    b, c_in, hw = xq_flat.shape
    c_feat = wt_enc.shape[0]
    tq = _pick_query_tile(hw)
    n_q = hw // tq

    # VMEM budget: double-buffered blocks + f32/bf16 temporaries, with margin.
    sim_block = tq * hw * 2                                   # bf16 output block
    packed_block = 6 * tq * 4
    in_blocks = (c_in * (tq + hw) + 8 * hw) * 4 + c_feat * c_in * 4
    temps = 3 * hw * tq * 4 + 6 * c_feat * (hw + tq)
    vmem_limit = int(min(max(4 * (2 * (sim_block + packed_block + in_blocks) + temps),
                             16 * 2 ** 20), 48 * 2 ** 20))

    cost = pl.CostEstimate(
        flops=int(b * (2 * hw * hw * c_feat        # single correlation matmul
                       + 2 * 8 * hw * hw           # fused soft-argmax + denom matmul
                       + 4 * c_in * c_feat * hw)),  # encoder FMAs
        transcendentals=int(b * (hw * hw + hw)),
        bytes_accessed=int(b * (4 * 2 * c_in * hw + 2 * hw * hw + 4 * 6 * hw)),
    )

    kernel = _make_fused_kernel(_use_bf16_exp())

    return pl.pallas_call(
        kernel,
        out_shape=(
            jax.ShapeDtypeStruct((b, hw, hw), jnp.bfloat16),   # sim_matrix[q, s]
            jax.ShapeDtypeStruct((b, 6, hw), jnp.float32),     # packed decode/match
        ),
        grid=(b, n_q),
        in_specs=[
            pl.BlockSpec((1, c_in, tq), lambda ib, iq: (ib, 0, iq)),   # query tile
            pl.BlockSpec((1, c_in, hw), lambda ib, iq: (ib, 0, 0)),    # full support
            pl.BlockSpec((c_feat, c_in), lambda ib, iq: (0, 0)),
            pl.BlockSpec((8, hw), lambda ib, iq: (0, 0)),
        ],
        out_specs=(
            pl.BlockSpec((1, tq, hw), lambda ib, iq: (ib, iq, 0)),
            pl.BlockSpec((1, 6, tq), lambda ib, iq: (ib, 0, iq)),
        ),
        compiler_params=pltpu.CompilerParams(
            dimension_semantics=("parallel", "parallel"),
            vmem_limit_bytes=vmem_limit),
        cost_estimate=cost,
    )(xq_flat, xs_flat, wt_enc, coords8)


# ----------------------------------------------------------------------------
# Glue: deterministic parameters, coordinate grids, PyTorch-convention I/O.
# ----------------------------------------------------------------------------
def _norm_grid_rows(h, w):
    # torch.meshgrid((linspace(-1+1/h, 1-1/h, h), linspace(-1+1/w, 1-1/w, w)));
    # stacked as (x, y) rows, row-major flattened over (h, w) -> (2, HW).
    ys = np.linspace(-1.0 + 1.0 / h, 1.0 - 1.0 / h, h, dtype=np.float32)
    xs = np.linspace(-1.0 + 1.0 / w, 1.0 - 1.0 / w, w, dtype=np.float32)
    yy, xx = np.meshgrid(ys, xs, indexing="ij")
    return np.stack([xx, yy], axis=0).reshape(2, h * w)


class RegressionMatcherPallas:
    def __init__(self, h=16, w=16, c_in=3, c_feat=32, seed=0):
        self.h_resized = h
        self.w_resized = w
        self.c_in = c_in
        # TODO(synk): loftr/decoder are external nn.Modules; stand-in is a
        # deterministic 1x1-conv encoder + correlation + soft-argmax decoder.
        # NOTE: c_feat=32 underfills the MXU contraction (25% on v5e, 12.5% on
        # v6e/v7x); raising it to 128/256 is wall-time free if more capacity helps.
        key = jax.random.PRNGKey(seed)
        w_enc = jax.random.normal(key, (c_in, c_feat), jnp.float32) / math.sqrt(c_in)
        # Fold the 1/sqrt(cfeat) correlation scale into the weight
        # ((X W s^.5)(X' W s^.5)^T == s (X W)(X' W)^T); store transposed (CFEAT, C).
        self.wt_enc = jnp.transpose(w_enc) * np.float32(c_feat ** -0.25)

        grid2 = _norm_grid_rows(h, w)                       # (2, HW) rows = (x, y)
        # Support-coord matrix for the fused soft-argmax + denominator matmul:
        # rows [x, y, 1, 0,0,0,0,0] -> one MXU dot yields Sum x*p, Sum y*p, Sum p.
        coords8 = np.zeros((8, h * w), np.float32)
        coords8[0:2] = grid2
        coords8[2] = 1.0
        self.coords8 = jnp.asarray(coords8).astype(jnp.bfloat16)
        # Query coord grid for match(); per-batch constant, concatenated on host.
        self.qgrid = jnp.asarray(np.transpose(grid2.reshape(2, h, w), (1, 2, 0)))

    def forward(self, batch):
        h, w = self.h_resized, self.w_resized
        hw = h * w
        data = {}
        data["image0"], data["image0_color"] = batch["query"], batch["query"]
        data["image1"], data["image1_color"] = batch["support"], batch["support"]
        data["pair_names"] = batch.get("query_identifier", ["None"])
        if "query_mask" in batch and "support_mask" in batch:
            data["mask0"] = batch["query_mask"]
            data["mask1"] = batch["support_mask"]
        # TODO(synk): training-branch key plumbing (K0/K1/T_0to1/inv/depths) omitted.

        b = batch["query"].shape[0]
        # NCHW -> (B, C, HW): pure reshape, no transpose (channels-first, lane-dense).
        xq = batch["query"].reshape(b, self.c_in, hw)
        xs = batch["support"].reshape(b, self.c_in, hw)

        sim, packed = fused_match(xq, xs, self.wt_enc, self.coords8)

        dense_flow = packed[:, 0:2, :].reshape(b, 2, h, w)     # (B,2,H,W) no transpose
        dense_cert = packed[:, 2:3, :].reshape(b, 1, h, w)     # (B,1,H,W) no transpose
        flow_clamped = packed[:, 3:5, :].reshape(b, 2, h, w)   # clamp(flow) from kernel
        cert_sig = packed[:, 5, :].reshape(b, h, w)            # sigmoid(logit) from kernel

        # match() outputs: cat(query_coords, clamp(flow)) with HW-last layout.
        self._warp = jnp.concatenate(
            [jnp.broadcast_to(self.qgrid[None], (b, h, w, 2)),
             jnp.transpose(flow_clamped, (0, 2, 3, 1))], axis=-1)
        self._cert = cert_sig
        return {1: {"dense_flow": dense_flow, "dense_certainty": dense_cert},
                "data": data, "sim_matrix": sim}

    def match(self, im1, im2, batched=True):
        dense_corresps = self.forward({"query": im1, "support": im2})
        del dense_corresps
        if batched:
            return self._warp, self._cert
        return self._warp[0], self._cert[0]

    # TODO(synk): sample() (numpy random choice), nms() (max_pool2d),
    # cycle_constraint()/stable_neighbours() (F.grid_sample bilinear) and
    # upsample_preds are not reproduced here.


if __name__ == "__main__":
    B, CIN, H, W = 2, 3, 16, 16
    key = jax.random.PRNGKey(0)
    k1, k2 = jax.random.split(key)
    query = jax.random.uniform(k1, (B, CIN, H, W), dtype=jnp.float32)
    support = jax.random.uniform(k2, (B, CIN, H, W), dtype=jnp.float32)

    matcher = RegressionMatcherPallas(h=H, w=W, c_in=CIN, c_feat=32, seed=0)
    dense_corresps = matcher.forward({"query": query, "support": support})
    warp, cert = matcher.match(query, support, batched=True)

    jax.block_until_ready((dense_corresps["sim_matrix"],
                           dense_corresps[1]["dense_flow"],
                           dense_corresps[1]["dense_certainty"],
                           warp, cert))

    # ---- correctness checks against a pure-numpy reference of the stand-in ----
    HW = H * W
    wt = np.asarray(matcher.wt_enc, np.float32)                # (CFEAT, C)
    xqf = np.asarray(query, np.float32).reshape(B, CIN, HW)
    xsf = np.asarray(support, np.float32).reshape(B, CIN, HW)
    fq_ref = np.einsum("fc,bcq->bfq", wt, xqf)
    fs_ref = np.einsum("fc,bcs->bfs", wt, xsf)
    sim_ref = np.einsum("bfq,bfs->bqs", fq_ref, fs_ref)        # (B, HWq, HWs)

    sim_out = np.asarray(dense_corresps["sim_matrix"], np.float32)
    np.testing.assert_allclose(sim_out, sim_ref, rtol=5e-2, atol=3e-2)  # bf16 path

    # float64 softmax / soft-argmax reference.
    s64 = sim_ref.astype(np.float64)
    m_ref = s64.max(axis=2)                                    # (B, HWq) logits
    p_ref = np.exp(s64 - m_ref[..., None])
    p_ref /= p_ref.sum(axis=2, keepdims=True)
    grid2 = _norm_grid_rows(H, W)                              # (2, HWs)
    flow_ref = np.einsum("bqs,cs->bcq", p_ref, grid2).reshape(B, 2, H, W)

    flow_out = np.asarray(dense_corresps[1]["dense_flow"], np.float32)
    logit_out = np.asarray(dense_corresps[1]["dense_certainty"], np.float32)[:, 0]
    np.testing.assert_allclose(flow_out, flow_ref, atol=3e-2)          # bf16 + approx recip
    np.testing.assert_allclose(logit_out, m_ref.reshape(B, H, W), atol=3e-2)

    # fused match() post-processing consistency
    qgrid = np.transpose(grid2.reshape(2, H, W), (1, 2, 0))
    np.testing.assert_allclose(np.asarray(warp[..., :2]),
                               np.broadcast_to(qgrid, (B, H, W, 2)),
                               rtol=1e-6, atol=1e-6)
    np.testing.assert_allclose(np.asarray(warp[..., 2:]),
                               np.clip(np.transpose(flow_out, (0, 2, 3, 1)), -1.0, 1.0),
                               rtol=1e-6, atol=1e-6)
    np.testing.assert_allclose(np.asarray(cert),
                               1.0 / (1.0 + np.exp(-logit_out.astype(np.float64))),
                               rtol=1e-3, atol=1e-5)
    assert np.isfinite(sim_out).all()
    assert np.all(np.abs(np.asarray(warp[..., 2:])) <= 1.0 + 1e-6)

    print("KERNEL_OK")
</pallas_src>

<mosaic_0001>
module attributes {stable_mosaic.version = 11 : i64} {
  func.func @_fused_matcher_kernel(%arg0: i32, %arg1: i32, %arg2: memref<1x3x128xf32, #tpu.memory_space<vmem>>, %arg3: memref<1x3x256xf32, #tpu.memory_space<vmem>>, %arg4: memref<32x3xf32, #tpu.memory_space<vmem>>, %arg5: memref<8x256xbf16, #tpu.memory_space<vmem>>, %arg6: memref<1x128x256xbf16, #tpu.memory_space<vmem>>, %arg7: memref<1x6x128xf32, #tpu.memory_space<vmem>>) attributes {dimension_semantics = [#tpu.dimension_semantics<parallel>, #tpu.dimension_semantics<parallel>], iteration_bounds = array<i64: 2, 2>, scalar_prefetch = 0 : i64, scratch_operands = 0 : i64, tpu.core_type = #tpu.core_type<tc>, window_params = [{transform_indices = @transform_0, window_bounds = array<i64: 1, 3, 128>}, {transform_indices = @transform_1, window_bounds = array<i64: 1, 3, 256>}, {pipeline_mode = #tpu.pipeline_mode<synchronous>, transform_indices = @transform_2, window_bounds = array<i64: 32, 3>}, {pipeline_mode = #tpu.pipeline_mode<synchronous>, transform_indices = @transform_3, window_bounds = array<i64: 8, 256>}, {transform_indices = @transform_4, window_bounds = array<i64: 1, 128, 256>}, {transform_indices = @transform_5, window_bounds = array<i64: 1, 6, 128>}]} {
    %c0 = arith.constant 0 : index
    %c0_0 = arith.constant 0 : index
    %c0_1 = arith.constant 0 : index
    %0 = vector.load %arg2[%c0, %c0_0, %c0_1] : memref<1x3x128xf32, #tpu.memory_space<vmem>>, vector<1x3x128xf32>
    %1 = vector.shape_cast %0 : vector<1x3x128xf32> to vector<3x128xf32>
    %c0_2 = arith.constant 0 : index
    %c0_3 = arith.constant 0 : index
    %c0_4 = arith.constant 0 : index
    %2 = vector.load %arg3[%c0_2, %c0_3, %c0_4] : memref<1x3x256xf32, #tpu.memory_space<vmem>>, vector<1x3x256xf32>
    %3 = vector.shape_cast %2 : vector<1x3x256xf32> to vector<3x256xf32>
    %c0_5 = arith.constant 0 : index
    %c0_6 = arith.constant 0 : index
    %4 = vector.load %arg4[%c0_5, %c0_6] : memref<32x3xf32, #tpu.memory_space<vmem>>, vector<32x3xf32>
    %5 = vector.extract_strided_slice %4 {offsets = [0, 0], sizes = [32, 1], strides = [1, 1]} : vector<32x3xf32> to vector<32x1xf32>
    %6 = vector.extract_strided_slice %1 {offsets = [0, 0], sizes = [1, 128], strides = [1, 1]} : vector<3x128xf32> to vector<1x128xf32>
    %7 = vector.broadcast %5 : vector<32x1xf32> to vector<32x128xf32>
    %8 = vector.broadcast %6 : vector<1x128xf32> to vector<32x128xf32>
    %9 = arith.mulf %7, %8 : vector<32x128xf32>
    %10 = vector.extract_strided_slice %4 {offsets = [0, 0], sizes = [32, 1], strides = [1, 1]} : vector<32x3xf32> to vector<32x1xf32>
    %11 = vector.extract_strided_slice %3 {offsets = [0, 0], sizes = [1, 256], strides = [1, 1]} : vector<3x256xf32> to vector<1x256xf32>
    %12 = vector.broadcast %10 : vector<32x1xf32> to vector<32x256xf32>
    %13 = vector.broadcast %11 : vector<1x256xf32> to vector<32x256xf32>
    %14 = arith.mulf %12, %13 : vector<32x256xf32>
    %15 = vector.extract_strided_slice %4 {offsets = [0, 1], sizes = [32, 1], strides = [1, 1]} : vector<32x3xf32> to vector<32x1xf32>
    %16 = vector.extract_strided_slice %1 {offsets = [1, 0], sizes = [1, 128], strides = [1, 1]} : vector<3x128xf32> to vector<1x128xf32>
    %17 = vector.broadcast %15 : vector<32x1xf32> to vector<32x128xf32>
    %18 = vector.broadcast %16 : vector<1x128xf32> to vector<32x128xf32>
    %19 = arith.mulf %17, %18 : vector<32x128xf32>
    %20 = arith.addf %9, %19 : vector<32x128xf32>
    %21 = vector.extract_strided_slice %4 {offsets = [0, 1], sizes = [32, 1], strides = [1, 1]} : vector<32x3xf32> to vector<32x1xf32>
    %22 = vector.extract_strided_slice %3 {offsets = [1, 0], sizes = [1, 256], strides = [1, 1]} : vector<3x256xf32> to vector<1x256xf32>
    %23 = vector.broadcast %21 : vector<32x1xf32> to vector<32x256xf32>
    %24 = vector.broadcast %22 : vector<1x256xf32> to vector<32x256xf32>
    %25 = arith.mulf %23, %24 : vector<32x256xf32>
    %26 = arith.addf %14, %25 : vector<32x256xf32>
    %27 = vector.extract_strided_slice %4 {offsets = [0, 2], sizes = [32, 1], strides = [1, 1]} : vector<32x3xf32> to vector<32x1xf32>
    %28 = vector.extract_strided_slice %1 {offsets = [2, 0], sizes = [1, 128], strides = [1, 1]} : vector<3x128xf32> to vector<1x128xf32>
    %29 = vector.broadcast %27 : vector<32x1xf32> to vector<32x128xf32>
    %30 = vector.broadcast %28 : vector<1x128xf32> to vector<32x128xf32>
    %31 = arith.mulf %29, %30 : vector<32x128xf32>
    %32 = arith.addf %20, %31 : vector<32x128xf32>
    %33 = vector.extract_strided_slice %4 {offsets = [0, 2], sizes = [32, 1], strides = [1, 1]} : vector<32x3xf32> to vector<32x1xf32>
    %34 = vector.extract_strided_slice %3 {offsets = [2, 0], sizes = [1, 256], strides = [1, 1]} : vector<3x256xf32> to vector<1x256xf32>
    %35 = vector.broadcast %33 : vector<32x1xf32> to vector<32x256xf32>
    %36 = vector.broadcast %34 : vector<1x256xf32> to vector<32x256xf32>
    %37 = arith.mulf %35, %36 : vector<32x256xf32>
    %38 = arith.addf %26, %37 : vector<32x256xf32>
    %39 = arith.truncf %32 : vector<32x128xf32> to vector<32x128xbf16>
    %40 = arith.truncf %38 : vector<32x256xf32> to vector<32x256xbf16>
    %cst = arith.constant dense<0.000000e+00> : vector<256x128xf32>
    %41 = tpu.matmul %40, %39, %cst {dimension_numbers = #tpu.dot_dimension_numbers<[0], [0], [1], [1], [0, 1, 1, 1], [], []>} : vector<32x256xbf16>, vector<32x128xbf16>, vector<256x128xf32> -> vector<256x128xf32>
    %42 = arith.truncf %41 : vector<256x128xf32> to vector<256x128xbf16>
    %43 = tpu.transpose %42, [1, 0] : vector<256x128xbf16> -> vector<128x256xbf16>
    %c0_7 = arith.constant 0 : index
    %c0_8 = arith.constant 0 : index
    %c0_9 = arith.constant 0 : index
    %44 = vector.load %arg6[%c0_7, %c0_8, %c0_9] : memref<1x128x256xbf16, #tpu.memory_space<vmem>>, vector<1x128x256xbf16>
    %45 = vector.shape_cast %44 : vector<1x128x256xbf16> to vector<128x256xbf16>
    %46 = vector.shape_cast %43 : vector<128x256xbf16> to vector<1x128x256xbf16>
    tpu.vector_store %arg6[%c0_7, %c0_8, %c0_9], %46 {strides = array<i32>} : memref<1x128x256xbf16, #tpu.memory_space<vmem>>, vector<1x128x256xbf16>,
    %cst_10 = arith.constant dense<0xFF800000> : vector<128xf32>
    %47 = vector.multi_reduction <maximumf>, %41, %cst_10 [0] : vector<256x128xf32> to vector<128xf32>
    %48 = vector.shape_cast %47 : vector<128xf32> to vector<1x128xf32>
    %49 = vector.broadcast %48 : vector<1x128xf32> to vector<256x128xf32>
    %50 = arith.subf %41, %49 : vector<256x128xf32>
    %51 = math.exp %50 : vector<256x128xf32>
    %52 = arith.truncf %51 : vector<256x128xf32> to vector<256x128xbf16>
    %c0_11 = arith.constant 0 : index
    %c0_12 = arith.constant 0 : index
    %53 = vector.load %arg5[%c0_11, %c0_12] : memref<8x256xbf16, #tpu.memory_space<vmem>>, vector<8x256xbf16>
    %cst_13 = arith.constant dense<0.000000e+00> : vector<8x128xf32>
    %54 = tpu.matmul %53, %52, %cst_13 {dimension_numbers = #tpu.dot_dimension_numbers<[1], [0], [0], [1], [0, 0, 1, 1], [], []>} : vector<8x256xbf16>, vector<256x128xbf16>, vector<8x128xf32> -> vector<8x128xf32>
    %55 = vector.extract_strided_slice %54 {offsets = [2, 0], sizes = [1, 128], strides = [1, 1]} : vector<8x128xf32> to vector<1x128xf32>
    %56 = tpu.reciprocal %55 {approx = true} : vector<1x128xf32> -> vector<1x128xf32>
    %57 = vector.extract_strided_slice %54 {offsets = [0, 0], sizes = [2, 128], strides = [1, 1]} : vector<8x128xf32> to vector<2x128xf32>
    %58 = vector.broadcast %56 : vector<1x128xf32> to vector<2x128xf32>
    %59 = arith.mulf %57, %58 : vector<2x128xf32>
    %cst_14 = arith.constant -1.000000e+00 : f32
    %cst_15 = arith.constant 1.000000e+00 : f32
    %60 = vector.broadcast %cst_14 : f32 to vector<2x128xf32>
    %61 = arith.maximumf %60, %59 : vector<2x128xf32>
    %62 = vector.broadcast %cst_15 : f32 to vector<2x128xf32>
    %63 = arith.minimumf %62, %61 : vector<2x128xf32>
    %cst_16 = arith.constant 0.000000e+00 : f32
    %64 = vector.broadcast %cst_16 : f32 to vector<1x128xf32>
    %65 = arith.subf %64, %48 : vector<1x128xf32>
    %66 = math.exp %65 : vector<1x128xf32>
    %cst_17 = arith.constant 1.000000e+00 : f32
    %67 = vector.broadcast %cst_17 : f32 to vector<1x128xf32>
    %68 = arith.addf %67, %66 : vector<1x128xf32>
    %69 = tpu.reciprocal %68 : vector<1x128xf32> -> vector<1x128xf32>
    %c0_18 = arith.constant 0 : index
    %c0_19 = arith.constant 0 : index
    %c0_20 = arith.constant 0 : index
    %70 = vector.load %arg7[%c0_18, %c0_19, %c0_20] : memref<1x6x128xf32, #tpu.memory_space<vmem>>, vector<1x2x128xf32>
    %71 = vector.shape_cast %70 : vector<1x2x128xf32> to vector<2x128xf32>
    %72 = vector.shape_cast %59 : vector<2x128xf32> to vector<1x2x128xf32>
    tpu.vector_store %arg7[%c0_18, %c0_19, %c0_20], %72 {strides = array<i32>} : memref<1x6x128xf32, #tpu.memory_space<vmem>>, vector<1x2x128xf32>,
    %c0_21 = arith.constant 0 : index
    %c2 = arith.constant 2 : index
    %c0_22 = arith.constant 0 : index
    %73 = vector.load %arg7[%c0_21, %c2, %c0_22] : memref<1x6x128xf32, #tpu.memory_space<vmem>>, vector<1x1x128xf32>
    %74 = vector.shape_cast %73 : vector<1x1x128xf32> to vector<1x128xf32>
    %75 = vector.shape_cast %48 : vector<1x128xf32> to vector<1x1x128xf32>
    tpu.vector_store %arg7[%c0_21, %c2, %c0_22], %75 {strides = array<i32>} : memref<1x6x128xf32, #tpu.memory_space<vmem>>, vector<1x1x128xf32>,
    %c0_23 = arith.constant 0 : index
    %c3 = arith.constant 3 : index
    %c0_24 = arith.constant 0 : index
    %76 = vector.load %arg7[%c0_23, %c3, %c0_24] : memref<1x6x128xf32, #tpu.memory_space<vmem>>, vector<1x2x128xf32>
    %77 = vector.shape_cast %76 : vector<1x2x128xf32> to vector<2x128xf32>
    %78 = vector.shape_cast %63 : vector<2x128xf32> to vector<1x2x128xf32>
    tpu.vector_store %arg7[%c0_23, %c3, %c0_24], %78 {strides = array<i32>} : memref<1x6x128xf32, #tpu.memory_space<vmem>>, vector<1x2x128xf32>,
    %c0_25 = arith.constant 0 : index
    %c5 = arith.constant 5 : index
    %c0_26 = arith.constant 0 : index
    %79 = vector.load %arg7[%c0_25, %c5, %c0_26] : memref<1x6x128xf32, #tpu.memory_space<vmem>>, vector<1x1x128xf32>
    %80 = vector.shape_cast %79 : vector<1x1x128xf32> to vector<1x128xf32>
    %81 = vector.shape_cast %69 : vector<1x128xf32> to vector<1x1x128xf32>
    tpu.vector_store %arg7[%c0_25, %c5, %c0_26], %81 {strides = array<i32>} : memref<1x6x128xf32, #tpu.memory_space<vmem>>, vector<1x1x128xf32>,
    return
  }
  func.func @transform_0(%arg0: i32, %arg1: i32) -> (i32, i32, i32) {
    %c0_i32 = arith.constant 0 : i32
    %c0_i32_0 = arith.constant 0 : i32
    return %arg0, %c0_i32, %arg1 : i32, i32, i32
  }
  func.func @transform_1(%arg0: i32, %arg1: i32) -> (i32, i32, i32) {
    %c0_i32 = arith.constant 0 : i32
    %c0_i32_0 = arith.constant 0 : i32
    %c0_i32_1 = arith.constant 0 : i32
    return %arg0, %c0_i32, %c0_i32_0 : i32, i32, i32
  }
  func.func @transform_2(%arg0: i32, %arg1: i32) -> (i32, i32) {
    %c0_i32 = arith.constant 0 : i32
    %c0_i32_0 = arith.constant 0 : i32
    %c0_i32_1 = arith.constant 0 : i32
    return %c0_i32, %c0_i32_0 : i32, i32
  }
  func.func @transform_3(%arg0: i32, %arg1: i32) -> (i32, i32) {
    %c0_i32 = arith.constant 0 : i32
    %c0_i32_0 = arith.constant 0 : i32
    %c0_i32_1 = arith.constant 0 : i32
    return %c0_i32, %c0_i32_0 : i32, i32
  }
  func.func @transform_4(%arg0: i32, %arg1: i32) -> (i32, i32, i32) {
    %c0_i32 = arith.constant 0 : i32
    %c0_i32_0 = arith.constant 0 : i32
    return %arg0, %arg1, %c0_i32 : i32, i32, i32
  }
  func.func @transform_5(%arg0: i32, %arg1: i32) -> (i32, i32, i32) {
    %c0_i32 = arith.constant 0 : i32
    %c0_i32_0 = arith.constant 0 : i32
    return %arg0, %c0_i32, %arg1 : i32, i32, i32
  }
}

</mosaic_0001>

<bundles_post_ra>
// kernel: tpu_custom_call.1
= control target key start
LH: loop header
LB: loop body
LE: loop exit
PB: predicated region body
PF: predicated region fallthrough
CT: control target
= control target key end

     0   :  { %11 = vsyncpa [#allocation3], 0  ;;  %s2127_s0 = inlined_call_operand.vmem [shape: f32[2,3,256], index: 0, kind: input, shape index: {}]   ;;  %s2128_s1 = inlined_call_operand.vmem [shape: f32[2,3,256], index: 1, kind: input, shape index: {}]   ;;  %s2129_s2 = inlined_call_operand.vmem [shape: f32[32,3], index: 2, kind: input, shape index: {}]   ;;  %s2130_s3 = inlined_call_operand.vmem [shape: bf16[8,256], index: 3, kind: input, shape index: {}]   ;;  %s2131_s4 = inlined_call_operand.hbm [shape: bf16[2,256,256], index: 4, kind: output, shape index: {0}]   ;;  %s2132_s5 = inlined_call_operand.vmem [shape: f32[2,6,256], index: 5, kind: output, shape index: {1}]  }
   0x1   :  { %13 = vsyncpa [#allocation3 + $0x1], 0  ;;  %s1657_s18 = smov 0   ;;  %s1659_s19 = smov 0  }
   0x2   :  { %s1661_s20 = smov 0   ;;  %s1663_s21 = smov 0  }
   0x3   :  { %s1665_s22 = smov 0   ;;  %s1667_s23 = smov 0  }
   0x4   :  { %s1669_s24 = smov 0   ;;  %s1671_s25 = smov 0  }
   0x5 LB: > { %s1240_s26 = sadd.s32 4294967295, %s1619_s25   ;;  %s1241_s27 = sadd.s32 4294967294, %s1619_s25   ;;  %s1619_s25 = sphi %s1671_s25, %s19_s25   ;;  %s1615_s24 = sphi %s1669_s24, %s2141_s24   ;;  %s1611_s23 = sphi %s1667_s23, %s2140_s23   ;;  %s1607_s22 = sphi %s1665_s22, %s2139_s22   ;;  %s1603_s21 = sphi %s1663_s21, %s2138_s21   ;;  %s1599_s20 = sphi %s1661_s20, %s2137_s20   ;;  %s1595_s19 = sphi %s1659_s19, %s2136_s19   ;;  %s1591_s18 = sphi %s1657_s18, %s2135_s18  }
   0x6   : > { %s28_s28 = sadd.s32 1, %s1611_s23  ;;  %s31_s29 = sadd.s32 1, %s1615_s24 }
   0x7   : > { %p29_p0 = scmp.ge.s32.totalorder %s28_s28, 2  ;;  %p146_p1 = scmp.ne.s32.totalorder %s1599_s20, %s1595_s19 }
   0x8   : > { %p147_p2 = scmp.eq.s32.totalorder %s1240_s26, 3  ;;  %p152_p5 = scmp.ne.s32.totalorder %s1595_s19, %s1591_s18 }
   0x9   : > { %s2143_s28 = smov (%p29_p0, %s28_s28), 0  ;;  %s2145_s29 = smov (!%p29_p0, %s31_s29), %s1615_s24 }
   0xa   : > { %s132_s30 = ssub.s32 %s1611_s23, %s2143_s28  ;;  %p1708_p3 = por %p147_p2, %p146_p1 }
   0xb   : > { %p33_p4 = scmp.ge.s32.totalorder %s2145_s29, 2  ;;  %p153_p6 = scmp.eq.s32.totalorder %s1241_s27, 3 }
   0xc   : > { %p1244_p7 = scmp.ge.s32.totalorder %s1619_s25, 1  ;;  %p224_p9 = scmp.lt.s32.totalorder %s1619_s25, 5 }
   0xd   : > { %s2147_s29 = smov (%p33_p4, %s2145_s29), 0  ;;  %p1717_p8 = por %p153_p6, %p152_p5 }
   0xe   : > { %s131_s8 = ssub.s32 %s1615_s24, %s2147_s29  ;;  %s136_s9 = sadd.s32 1, %s1599_s20 }
   0xf   : > { %s133_s10 = sor.u32 %s132_s30, %s131_s8  ;;  %p225_p10 = pnand %p1244_p7, %p224_p9 }
  0x10   : > { %p134_p11 = scmp.eq.s32.totalorder %s133_s10, 0  ;;  %p268_p12 = scmp.lt.s32.totalorder (!%p225_p10), %s1607_s22, 1 }
  0x11   : > { %228 = sbr.rel (%p225_p10) target bundleno = 844 (0x34c), region = 36  ;;  %p270_p13 = scmp.lt.s32.totalorder (!%p225_p10), %s1603_s21, 1 }
  0x12   : > { %s1726_s11 = scalar_select %p134_p11, %s1599_s20, %s136_s9  }
  0x13   : > { %s1295_s17 = sshll.u32 (!%p225_p10), %s1603_s21, 5  ;;  %s1290_s26 = sshll.u32 (!%p225_p10), %s1607_s22, 6 }
  0x16   : > { %v293_v0 = vld [vmem:[%s2129_s2] sm:$0xff]  ;;  %v1621_v1 = vmov 1   ;;  %v1622_v2 = vmov 0   ;;  %v294_v3 = vld [vmem:[%s2129_s2 + $0x8] sm:$0xff]  ;;  %v295_v4 = vld [vmem:[%s2129_s2 + $0x10] sm:$0xff]  ;;  %v1623_v6 = vmov 2   ;;  %v317_v7 = vlaneseq }
  0x17   : > { %1449 = vset.pattern.permute.xlu1 %v1621_v1  ;;  %1448 = vset.pattern.permute.xlu0 %v1622_v2  ;;  %v296_v5 = vld [vmem:[%s2129_s2 + $0x18] sm:$0xff]  ;;  %s269_s30 = scalar_select %p268_p12, %s1607_s22, 1  ;;  %vm514_vm0 = vcmask 261120  }
  0x18   : > { %353 = vperm.xlu1 %1449, %v293_v0   ;;  %299 = vperm.xlu0 %1448, %v293_v0   ;;  %s271_s8 = scalar_select %p270_p13, %s1603_s21, 1  ;;  %v318_v8 = vshrl.u32 %v317_v7, 7 }
  0x19   : > { %s1294_s9 = sshll.u32 %s269_s30, 3  ;;  %s1246_s10 = sshll.u32 %s269_s30, 1 }
  0x1a   : > { %s280_s14 = scalar_lea.vmem %s2128_s1, %s1294_s9  ;;  %s1747_s15 = sadd.s32 %s1246_s10, %s271_s8  ;;  %v370_v11 = vsub.s32 1, %v318_v8  ;;  %v386_v12 = vsub.s32 5, %v318_v8  ;;  %v319_v13 = vsub.s32 0, %v318_v8  ;;  %v332_v14 = vsub.s32 4, %v318_v8 }
  0x1b   : > { %v292_v15 = vld [vmem:[%s280_s14] sm:$0x77]  ;;  %s1247_s16 = sshll.u32 %s1747_s15, 2  ;;  %v1750_v18 = vsub.s32 2, %v318_v8  ;;  %v448_v19 = vsub.s32 6, %v318_v8  ;;  %s1251_s9 = sshll.u32 %s1747_s15, 3 }
  0x1c   : > { %357 = vperm.xlu1 %1449, %v294_v3   ;;  %304 = vperm.xlu0 %1448, %v294_v3   ;;  %v383_v20 = vrot.slane %v292_v15, %v370_v11  ;;  %v387_v21 = vrot.slane %v292_v15, %v386_v12  ;;  %v329_v22 = vrot.slane %v292_v15, %v319_v13  ;;  %s275_s27 = scalar_lea.vmem %s2127_s0, %s1247_s16  ;;  %s1910_s13 = scalar_lea.vmem %s2132_s5, %s1251_s9 }
  0x1d   : > { %v333_v23 = vrot.slane %v292_v15, %v332_v14  ;;  %v445_v26 = vrot.slane %v292_v15, %v1750_v18  ;;  %v449_v27 = vrot.slane %v292_v15, %v448_v19  ;;  %v291_v28 = vld [vmem:[%s275_s27] sm:$0x7]  ;;  %s255_s14 = sand.u32 1, %s1595_s19   ;;  %s1104_s27 = sadd.s32 %s1295_s17, %s1290_s26 }
  0x1e   : > { %v393_v29 = vrot.slane %v383_v20, %v370_v11  ;;  %v397_v30 = vrot.slane %v387_v21, %v370_v11  ;;  %v339_v31 = vrot.slane %v329_v22, %v319_v13  ;;  %v371_v33 = vrot.slane %v291_v28, %v370_v11  ;;  %s1245_s15 = sshll.u32 %s255_s14, 7  ;;  %s1291_s30 = sshll.u32 %s1104_s27, 6 }
  0x1f   : > { %v343_v32 = vrot.slane %v333_v23, %v319_v13  ;;  %v320_v34 = vrot.slane %v291_v28, %v319_v13  ;;  %v455_v36 = vrot.slane %v445_v26, %v1750_v18  ;;  %v459_v37 = vrot.slane %v449_v27, %v1750_v18  ;;  %s2025_s16 = scalar_lea.vmem [#allocation2], %s1245_s15  ;;  %s2067_s12 = scalar_lea.hbm %s2131_s4, %s1291_s30 }
  0x20   : > { %1450 = vset.pattern.permute.xlu1 %v1622_v2  ;;  %309 = vperm.xlu0 %1448, %v295_v4   ;;  %v433_v47 = vrot.slane %v291_v28, %v1750_v18  ;;  %s1107_s8 = sshll.u32 %s2025_s16, 4  ;;  %s2073_s21 = scalar_lea.sflag [#allocation3], %s255_s14  ;;  %s2069_s8 = int_to_ptr.vmem [resolvable:$true] %s1107_s8 }
  0x21   : > { %314 = vperm.xlu1 %1450, %v296_v5   ;;  %s1527_s22 = scalar_lea.vmem %s2069_s8, 2048  ;;  %s1624_s15 = smov [#allocation2]  }
  0x22   : > { %p1528_p0 = scmp.ne.s32.totalorder %s2069_s8, %s1527_s22 }
  0x24   : > { %1451 = vset.pattern.permute.xlu0 %v1621_v1  ;;  %p1529_p1 = pnand %p1528_p0, %p1708_p3 }
  0x25   : > { %1452 = vset.pattern.permute.xlu1 %v1621_v1  ;;  %361 = vperm.xlu0 %1451, %v295_v4  }
  0x26   : > { %365 = vperm.xlu1 %1452, %v296_v5   ;;  %p1530_p2 = pneg %p1529_p1 }
  0x29   : > { %1454 = vset.pattern.permute.xlu0 %v1623_v6 }
  0x2a   : > { %1453 = vset.pattern.permute.xlu1 %v1623_v6  ;;  %419 = vperm.xlu0 %1454, %v294_v3  }
  0x2b   : > { %415 = vperm.xlu1 %1453, %v293_v0  }
  0x2f   : > { %423 = vperm.xlu1 %1453, %v295_v4  }
  0x33   : > { %427 = vperm.xlu1 %1453, %v296_v5  }
  0x93   : > { %v354_v9 = vpop.permute.xlu1 %353  ;;  %v300_v10 = vpop.permute.xlu0 %299 }
  0x94   : > { %v398_v38 = vmul.f32 %v393_v29, %v354_v9  ;;  %v399_v39 = vmul.f32 %v397_v30, %v354_v9  ;;  %v344_v40 = vmul.f32 %v339_v31, %v300_v10  ;;  %v345_v41 = vmul.f32 %v343_v32, %v300_v10 }
  0x95   : > { %v372_v48 = vmul.f32 %v371_v33, %v354_v9  ;;  %v321_v49 = vmul.f32 %v320_v34, %v300_v10 }
  0x96   : > { %v406_v50 = vadd.f32 %v398_v38, %v344_v40  ;;  %v407_v51 = vadd.f32 %v399_v39, %v345_v41 }
  0x97   : > { %v358_v16 = vpop.permute.xlu1 %357  ;;  %v305_v17 = vpop.permute.xlu0 %304 }
  0x98   : > { %v400_v43 = vmul.f32 %v393_v29, %v358_v16  ;;  %v401_v44 = vmul.f32 %v397_v30, %v358_v16  ;;  %v346_v45 = vmul.f32 %v339_v31, %v305_v17  ;;  %v347_v46 = vmul.f32 %v343_v32, %v305_v17 }
  0x99   : > { %v373_v58 = vmul.f32 %v371_v33, %v358_v16  ;;  %v322_v59 = vmul.f32 %v320_v34, %v305_v17 }
  0x9a   : > { %v408_v53 = vadd.f32 %v400_v43, %v346_v45  ;;  %v409_v54 = vadd.f32 %v401_v44, %v347_v46 }
  0x9b   : > { %v310_v24 = vpop.permute.xlu0 %309 }
  0x9c   : > { %v315_v25 = vpop.permute.xlu1 %314  ;;  %v323_v62 = vmul.f32 %v320_v34, %v310_v24  ;;  %v348_v6 = vmul.f32 %v339_v31, %v310_v24  ;;  %v349_v7 = vmul.f32 %v343_v32, %v310_v24 }
  0x9d   : > { %v324_v11 = vmul.f32 %v320_v34, %v315_v25  ;;  %v350_v12 = vmul.f32 %v339_v31, %v315_v25  ;;  %v351_v15 = vmul.f32 %v343_v32, %v315_v25  ;;  %v377_v25 = vadd.f32 %v373_v58, %v322_v59 }
  0xa0   : > { %v362_v35 = vpop.permute.xlu0 %361 }
  0xa1   : > { %v366_v42 = vpop.permute.xlu1 %365  ;;  %v374_v63 = vmul.f32 %v371_v33, %v362_v35  ;;  %v402_v2 = vmul.f32 %v393_v29, %v362_v35  ;;  %v403_v3 = vmul.f32 %v397_v30, %v362_v35  ;;  %v376_v35 = vadd.f32 %v372_v48, %v321_v49 }
  0xa2   : > { %v404_v8 = vmul.f32 %v393_v29, %v366_v42  ;;  %v405_v9 = vmul.f32 %v397_v30, %v366_v42  ;;  %v375_v13 = vmul.f32 %v371_v33, %v366_v42 }
  0xa3   : > { %v410_v20 = vadd.f32 %v402_v2, %v348_v6  ;;  %v411_v21 = vadd.f32 %v403_v3, %v349_v7  ;;  %v378_v23 = vadd.f32 %v374_v63, %v323_v62 }
  0xa4   : > { %v412_v26 = vadd.f32 %v404_v8, %v350_v12  ;;  %v413_v27 = vadd.f32 %v405_v9, %v351_v15  ;;  %v379_v33 = vadd.f32 %v375_v13, %v324_v11 }
  0xa5   : > { %v420_v52 = vpop.permute.xlu0 %419 }
  0xa6   : > { %v462_v55 = vmul.f32 %v455_v36, %v420_v52  ;;  %v463_v56 = vmul.f32 %v459_v37, %v420_v52  ;;  %v416_v57 = vpop.permute.xlu1 %415  ;;  %v435_v28 = vmul.f32 %v433_v47, %v420_v52 }
  0xa7   : > { %v460_v60 = vmul.f32 %v455_v36, %v416_v57  ;;  %v461_v61 = vmul.f32 %v459_v37, %v416_v57  ;;  %v434_v24 = vmul.f32 %v433_v47, %v416_v57 }
  0xa8   : > { %v470_v0 = vadd.f32 %v462_v55, %v408_v53  ;;  %v471_v1 = vadd.f32 %v463_v56, %v409_v54  ;;  %v439_v43 = vadd.f32 %v435_v28, %v377_v25 }
  0xa9   : > { %v468_v4 = vadd.f32 %v460_v60, %v406_v50  ;;  %v469_v5 = vadd.f32 %v461_v61, %v407_v51  ;;  %v438_v44 = vadd.f32 %v434_v24, %v376_v35  ;;  %v1832_v24 = vld [vmem:[%s2130_s3] sm:$0xff] }
  0xaa   : > { %v424_v10 = vpop.permute.xlu1 %423 }
  0xab   : > { %v479_v14 = vpack.c.bf16 %v471_v1, %v469_v5  ;;  %v464_v16 = vmul.f32 %v455_v36, %v424_v10  ;;  %v465_v17 = vmul.f32 %v459_v37, %v424_v10  ;;  %v478_v19 = vpack.c.bf16 %v470_v0, %v468_v4 }
  0xac   : > { %v436_v22 = vmul.f32 %v433_v47, %v424_v10 }
  0xad   : > { %498 = vxpose.xlu1.c.b16.start [1/2] (short) %v479_v14, 128  ;;  %482 = vxpose.xlu0.c.b16.start [1/2] (short) %v478_v19, 128  ;;  %v472_v32 = vadd.f32 %v464_v16, %v410_v20  ;;  %v473_v38 = vadd.f32 %v465_v17, %v411_v21 }
  0xae   : > { %v428_v29 = vpop.permute.xlu1 %427  ;;  %v440_v41 = vadd.f32 %v436_v22, %v378_v23 }
  0xaf   : > { %v437_v30 = vmul.f32 %v433_v47, %v428_v29  ;;  %v466_v34 = vmul.f32 %v455_v36, %v428_v29  ;;  %v467_v31 = vmul.f32 %v459_v37, %v428_v29  ;;  %v476_v47 = vpack.c.bf16 %v439_v43, %v438_v44 }
  0xb1   : > { %v474_v39 = vadd.f32 %v466_v34, %v412_v26  ;;  %v475_v40 = vadd.f32 %v467_v31, %v413_v27  ;;  %v441_v42 = vadd.f32 %v437_v30, %v379_v33  ;;  %v1285_v30 = vcombine.high %v1832_v24, %v1832_v24 }
  0xb3   : > { %v481_v45 = vpack.c.bf16 %v475_v40, %v473_v38  ;;  %v480_v46 = vpack.c.bf16 %v474_v39, %v472_v32  ;;  %v477_v50 = vpack.c.bf16 %v441_v42, %v440_v41  ;;  %1057 = vmatprep.mubr.bf16.mxu1 %v1285_v30 }
  0xb5   : > { %499 = vxpose.xlu1.c.b16.end [2/2] (short) %v481_v45, 128  ;;  %483 = vxpose.xlu0.c.b16.end [2/2] (short) %v480_v46, 128 }
  0xb6   : > { %1336 = vmatprep.subr.bf16.mxu0 %v477_v50 }
  0xb7   : > { %1337 = vmatpush3.bf16.msra.mxu0 %v477_v50 }
  0xb8   : > { %1338 = vmatprep.subr.bf16.mxu0 %v476_v47 }
  0xbb   : > { %1339 = vmatpush3.bf16.msra.mxu0 %v476_v47 }
 0x113   : > { %v490_v36 = vpop.trf.xlu0  ;;  %v506_v51 = vpop.trf.xlu1 }
 0x114   : > { %1340 = vmatprep.mubr.msk.bf16.mxu0 %vm514_vm0, %v490_v36 }
 0x117   : > { %v491_v37 = vpop.trf.xlu0  ;;  %v507_v54 = vpop.trf.xlu1 }
 0x118   : > { %1341 = vmatmul.mubr.msk.bf16.vlgmr.msra.gmra.mxu0 %vm514_vm0, %v491_v37 }
 0x11b   : > { %v492_v48 = vpop.trf.xlu0  ;;  %v508_v56 = vpop.trf.xlu1 }
 0x11c   : > { %1344 = vmatprep.mubr.msk.bf16.mxu0 %vm514_vm0, %v492_v48 }
 0x11f   : > { %v493_v49 = vpop.trf.xlu0  ;;  %v509_v58 = vpop.trf.xlu1 }
 0x120   : > { %1345 = vmatmul.mubr.msk.bf16.gmra.mxu0 %vm514_vm0, %v493_v49 }
 0x123   : > { %v494_v52 = vpop.trf.xlu0  ;;  %v510_v59 = vpop.trf.xlu1 }
 0x124   : > { %1348 = vmatprep.mubr.msk.bf16.mxu0 %vm514_vm0, %v494_v52 }
 0x127   : > { %v495_v53 = vpop.trf.xlu0  ;;  %v511_v60 = vpop.trf.xlu1 }
 0x128   : > { %1349 = vmatmul.mubr.msk.bf16.gmra.mxu0 %vm514_vm0, %v495_v53 }
 0x12b   : > { %v496_v55 = vpop.trf.xlu0  ;;  %v512_v61 = vpop.trf.xlu1 }
 0x12c   : > { %1352 = vmatprep.mubr.msk.bf16.mxu0 %vm514_vm0, %v496_v55 }
 0x12f   : > { %v497_v57 = vpop.trf.xlu0  ;;  %v513_v62 = vpop.trf.xlu1 }
 0x130   : > { %1353 = vmatmul.mubr.msk.bf16.gmra.mxu0 %vm514_vm0, %v497_v57 }
 0x131   : > { %1356 = vmatprep.mubr.msk.bf16.mxu0 %vm514_vm0, %v506_v51 }
 0x138   : > { %1357 = vmatmul.mubr.msk.bf16.gmra.mxu0 %vm514_vm0, %v507_v54 }
 0x139   : > { %1360 = vmatprep.mubr.msk.bf16.mxu0 %vm514_vm0, %v508_v56 }
 0x140   : > { %1361 = vmatmul.mubr.msk.bf16.gmra.mxu0 %vm514_vm0, %v509_v58 }
 0x141   : > { %1364 = vmatprep.mubr.msk.bf16.mxu0 %vm514_vm0, %v510_v59 }
 0x148   : > { %1365 = vmatmul.mubr.msk.bf16.gmra.mxu0 %vm514_vm0, %v511_v60 }
 0x149   : > { %1368 = vmatprep.mubr.msk.bf16.mxu0 %vm514_vm0, %v512_v61 }
 0x150   : > { %1369 = vmatmul.mubr.msk.bf16.gmra.mxu0 %vm514_vm0, %v513_v62 }
 0x1d8   : > { %v1775_v63 = vpop.f32.mrf.mxu0 }
 0x1da   : > { %v1777_v0 = vpop.f32.mrf.mxu0 }
 0x1dc   : > { %v1779_v1 = vpop.f32.mrf.mxu0 }
 0x1dd   : > { %v725_v6 = vpack.c.bf16 %v1779_v1, %v1775_v63 }
 0x1de   : > { %v1781_v2 = vpop.f32.mrf.mxu0 }
 0x1df   : > { %v724_v3 = vpack.c.bf16 %v1781_v2, %v1777_v0 }
 0x1e0   : > { %v1785_v4 = vpop.f32.mrf.mxu0 }
 0x1e1   : > { %740 = vxpose.xlu0.c.b16.start [1/8] %v724_v3, 128  ;;  %v870_v41 = vmax.f32 %v1775_v63, %v1785_v4 }
 0x1e2   : > { %v1787_v5 = vpop.f32.mrf.mxu0 }
 0x1e3   : > { %v868_v43 = vmax.f32 %v1777_v0, %v1787_v5 }
 0x1e4   : > { %v1791_v7 = vpop.f32.mrf.mxu0 }
 0x1e5   : > { %741 = vxpose.xlu0.c.b16.cont [2/8] %v725_v6, 128  ;;  %v727_v12 = vpack.c.bf16 %v1791_v7, %v1785_v4  ;;  %v871_v40 = vmax.f32 %v1779_v1, %v1791_v7 }
 0x1e6   : > { %v1793_v8 = vpop.f32.mrf.mxu0 }
 0x1e7   : > { %v726_v9 = vpack.c.bf16 %v1793_v8, %v1787_v5  ;;  %v869_v44 = vmax.f32 %v1781_v2, %v1793_v8 }
 0x1e8   : > { %v1797_v10 = vpop.f32.mrf.mxu0 }
 0x1e9   : > { %742 = vxpose.xlu0.c.b16.cont [3/8] %v726_v9, 128  ;;  %v874_v50 = vmax.f32 %v870_v41, %v1797_v10 }
 0x1ea   : > { %v1799_v11 = vpop.f32.mrf.mxu0 }
 0x1eb   : > { %v872_v36 = vmax.f32 %v868_v43, %v1799_v11 }
 0x1ec   : > { %v1803_v13 = vpop.f32.mrf.mxu0 }
 0x1ed   : > { %743 = vxpose.xlu0.c.b16.cont [4/8] %v727_v12, 128  ;;  %v729_v19 = vpack.c.bf16 %v1803_v13, %v1797_v10  ;;  %v875_v45 = vmax.f32 %v871_v40, %v1803_v13 }
 0x1ee   : > { %v1805_v14 = vpop.f32.mrf.mxu0 }
 0x1ef   : > { %v728_v15 = vpack.c.bf16 %v1805_v14, %v1799_v11  ;;  %v873_v37 = vmax.f32 %v869_v44, %v1805_v14 }
 0x1f0   : > { %v1809_v16 = vpop.f32.mrf.mxu0 }
 0x1f1   : > { %744 = vxpose.xlu0.c.b16.cont [5/8] %v728_v15, 128  ;;  %v878_v49 = vmax.f32 %v874_v50, %v1809_v16 }
 0x1f2   : > { %v1811_v17 = vpop.f32.mrf.mxu0 }
 0x1f3   : > { %v876_v52 = vmax.f32 %v872_v36, %v1811_v17 }
 0x1f4   : > { %v1815_v20 = vpop.f32.mrf.mxu0 }
 0x1f5   : > { %745 = vxpose.xlu0.c.b16.cont [6/8] %v729_v19, 128  ;;  %v731_v27 = vpack.c.bf16 %v1815_v20, %v1809_v16  ;;  %v879_v48 = vmax.f32 %v875_v45, %v1815_v20 }
 0x1f6   : > { %v1817_v21 = vpop.f32.mrf.mxu0 }
 0x1f7   : > { %v730_v22 = vpack.c.bf16 %v1817_v21, %v1811_v17  ;;  %v877_v53 = vmax.f32 %v873_v37, %v1817_v21 }
 0x1f8   : > { %v1821_v23 = vpop.f32.mrf.mxu0 }
 0x1f9   : > { %746 = vxpose.xlu0.c.b16.cont [7/8] %v730_v22, 128  ;;  %v882_v56 = vmax.f32 %v878_v49, %v1821_v23 }
 0x1fa   : > { %v1823_v26 = vpop.f32.mrf.mxu0 }
 0x1fb   : > { %v880_v58 = vmax.f32 %v876_v52, %v1823_v26 }
 0x1fc   : > { %v1827_v28 = vpop.f32.mrf.mxu0 }
 0x1fd   : > { %747 = vxpose.xlu0.c.b16.end [8/8] %v731_v27, 128  ;;  %v733_v35 = vpack.c.bf16 %v1827_v28, %v1821_v23  ;;  %v883_v54 = vmax.f32 %v879_v48, %v1827_v28 }
 0x1fe   : > { %v1834_v29 = vpop.f32.mrf.mxu0 }
 0x1ff   : > { %v732_v34 = vpack.c.bf16 %v1834_v29, %v1823_v26  ;;  %v881_v59 = vmax.f32 %v877_v53, %v1834_v29 }
 0x200   : > { %v1840_v31 = vpop.f32.mrf.mxu0 }
 0x201   : > { %756 = vxpose.xlu1.c.b16.start [1/8] %v732_v34, 128  ;;  %v886_v61 = vmax.f32 %v882_v56, %v1840_v31 }
 0x202   : > { %v1842_v33 = vpop.f32.mrf.mxu0 }
 0x203   : > { %v884_v3 = vmax.f32 %v880_v58, %v1842_v33 }
 0x204   : > { %v1846_v25 = vpop.f32.mrf.mxu0 }
 0x205   : > { %757 = vxpose.xlu1.c.b16.cont [2/8] %v733_v35, 128  ;;  %v735_v46 = vpack.c.bf16 %v1846_v25, %v1840_v31  ;;  %v887_v60 = vmax.f32 %v883_v54, %v1846_v25 }
 0x206   : > { %v1848_v32 = vpop.f32.mrf.mxu0 }
 0x207   : > { %v734_v38 = vpack.c.bf16 %v1848_v32, %v1842_v33  ;;  %v885_v6 = vmax.f32 %v881_v59, %v1848_v32 }
 0x208   : > { %v1852_v39 = vpop.f32.mrf.mxu0 }
 0x209   : > { %758 = vxpose.xlu1.c.b16.cont [3/8] %v734_v38, 128  ;;  %v890_v19 = vmax.f32 %v886_v61, %v1852_v39 }
 0x20a   : > { %v1858_v42 = vpop.f32.mrf.mxu0 }
 0x20b   : > { %v888_v22 = vmax.f32 %v884_v3, %v1858_v42 }
 0x20c   : > { %v1868_v47 = vpop.f32.mrf.mxu0 }
 0x20d   : > { %759 = vxpose.xlu1.c.b16.cont [4/8] %v735_v46, 128  ;;  %v737_v9 = vpack.c.bf16 %v1868_v47, %v1852_v39  ;;  %v891_v12 = vmax.f32 %v887_v60, %v1868_v47 }
 0x20e   : > { %v1874_v51 = vpop.f32.mrf.mxu0 }
 0x20f   : > { %v736_v55 = vpack.c.bf16 %v1874_v51, %v1858_v42  ;;  %v889_v27 = vmax.f32 %v885_v6, %v1874_v51 }
 0x210   : > { %v1882_v57 = vpop.f32.mrf.mxu0 }
 0x211   : > { %760 = vxpose.xlu1.c.b16.cont [5/8] %v736_v55, 128  ;;  %v894_v35 = vmax.f32 %v890_v19, %v1882_v57 }
 0x212   : > { %v1888_v62 = vpop.f32.mrf.mxu0 }
 0x213   : > { %v892_v38 = vmax.f32 %v888_v22, %v1888_v62 }
 0x214   : > { %v1895_v15 = vpop.f32.mrf.mxu0 }
 0x215   : > { %v895_v30 = vmax.f32 %v891_v12, %v1895_v15  ;;  %761 = vxpose.xlu1.c.b16.cont [6/8] %v737_v9, 128  ;;  %v739_v45 = vpack.c.bf16 %v1895_v15, %v1882_v57 }
 0x216   : > { %v712_v34 = vpop.f32.mrf.mxu0 }
 0x217   : > { %v738_v40 = vpack.c.bf16 %v712_v34, %v1888_v62  ;;  %v893_v41 = vmax.f32 %v889_v27, %v712_v34  ;;  %v897_v43 = vmax.f32 %v894_v35, %v895_v30 }
 0x219   : > { %v896_v44 = vmax.f32 %v892_v38, %v893_v41  ;;  %762 = vxpose.xlu1.c.b16.cont [7/8] %v738_v40, 128 }
 0x21b   : > { %v898_v46 = vmax.f32 %v896_v44, %v897_v43 }
 0x21d   : > { %v899_v50 = vrot.slane %v898_v46, 4  ;;  %763 = vxpose.xlu1.c.b16.end [8/8] %v739_v45, 128 }
 0x21f   : > { %v900_v36 = vmax.f32 %v898_v46, %v899_v50 }
 0x221   : > { %v901_v37 = vrot.slane %v900_v36, 2 }
 0x223   : > { %v902_v48 = vmax.f32 %v900_v36, %v901_v37 }
 0x225   : > { %v903_v49 = vrot.slane %v902_v48, 1 }
 0x227   : > { %v1912_v52 = vmax.f32 %v902_v48, %v903_v49 }
 0x229   : > { %1079 = vst [vmem:[%s1910_s13 + $0x2] sm:$0x1] %v1912_v52  ;;  %v913_v53 = vsub.f32 %v1799_v11, %v1912_v52  ;;  %v914_v54 = vsub.f32 %v1805_v14, %v1912_v52  ;;  %v934_v55 = vsub.f32 %v712_v34, %v1912_v52  ;;  %v917_v56 = vsub.f32 %v1811_v17, %v1912_v52 }
 0x22a   : > { %v918_v59 = vsub.f32 %v1817_v21, %v1912_v52  ;;  %v919_v61 = vsub.f32 %v1809_v16, %v1912_v52  ;;  %v920_v11 = vsub.f32 %v1815_v20, %v1912_v52  ;;  %v921_v14 = vsub.f32 %v1823_v26, %v1912_v52 }
 0x22b   : > { %v953_v58 = vmul.f32 1.442695, %v913_v53  ;;  %v955_v60 = vmul.f32 1.442695, %v914_v54  ;;  %v995_v3 = vmul.f32 1.442695, %v934_v55  ;;  %v922_v17 = vsub.f32 %v1834_v29, %v1912_v52 }
 0x22c   : > { %v961_v6 = vmul.f32 1.442695, %v917_v56  ;;  %v963_v9 = vmul.f32 1.442695, %v918_v59  ;;  %v923_v21 = vsub.f32 %v1821_v23, %v1912_v52  ;;  %v965_v12 = vmul.f32 1.442695, %v919_v61 }
 0x22d   : > { %1457 = vpow2.f32 %v953_v58  ;;  %v924_v16 = vsub.f32 %v1827_v28, %v1912_v52  ;;  %v967_v19 = vmul.f32 1.442695, %v920_v11  ;;  %v925_v20 = vsub.f32 %v1842_v33, %v1912_v52 }
 0x22e   : > { %1459 = vpow2.f32 %v955_v60  ;;  %v969_v26 = vmul.f32 1.442695, %v921_v14  ;;  %v926_v22 = vsub.f32 %v1848_v32, %v1912_v52  ;;  %v971_v29 = vmul.f32 1.442695, %v922_v17 }
 0x22f   : > { %1461 = vpow2.f32 %v995_v3  ;;  %v927_v27 = vsub.f32 %v1840_v31, %v1912_v52  ;;  %v973_v23 = vmul.f32 1.442695, %v923_v21  ;;  %v928_v30 = vsub.f32 %v1846_v25, %v1912_v52 }
 0x230   : > { %1463 = vpow2.f32 %v961_v6  ;;  %v975_v28 = vmul.f32 1.442695, %v924_v16  ;;  %v929_v33 = vsub.f32 %v1858_v42, %v1912_v52  ;;  %v977_v34 = vmul.f32 1.442695, %v925_v20 }
 0x231   : > { %1465 = vpow2.f32 %v963_v9  ;;  %v930_v32 = vsub.f32 %v1874_v51, %v1912_v52  ;;  %v979_v35 = vmul.f32 1.442695, %v926_v22  ;;  %v931_v31 = vsub.f32 %v1852_v39, %v1912_v52 }
 0x232   : > { %1467 = vpow2.f32 %v965_v12  ;;  %v981_v38 = vmul.f32 1.442695, %v927_v27  ;;  %v932_v25 = vsub.f32 %v1868_v47, %v1912_v52  ;;  %v983_v40 = vmul.f32 1.442695, %v928_v30 }
 0x233   : > { %1469 = vpow2.f32 %v967_v19  ;;  %v933_v42 = vsub.f32 %v1888_v62, %v1912_v52  ;;  %v985_v41 = vmul.f32 1.442695, %v929_v33  ;;  %v935_v51 = vsub.f32 %v1882_v57, %v1912_v52 }
 0x234   : > { %1471 = vpow2.f32 %v969_v26  ;;  %v987_v44 = vmul.f32 1.442695, %v930_v32  ;;  %v936_v45 = vsub.f32 %v1895_v15, %v1912_v52  ;;  %v989_v47 = vmul.f32 1.442695, %v931_v31 }
 0x235   : > { %1473 = vpow2.f32 %v971_v29  ;;  %v991_v46 = vmul.f32 1.442695, %v932_v25  ;;  %v1073_v50 = vsub.f32 0.0, %v1912_v52  ;;  %v993_v37 = vmul.f32 1.442695, %v933_v42 }
 0x236   : > { %1475 = vpow2.f32 %v973_v23  ;;  %v997_v48 = vmul.f32 1.442695, %v935_v51  ;;  %v999_v15 = vmul.f32 1.442695, %v936_v45  ;;  %v915_v58 = vsub.f32 %v1797_v10, %v1912_v52 }
 0x237   : > { %1477 = vpow2.f32 %v975_v28  ;;  %v1074_v55 = vmul.f32 1.442695, %v1073_v50  ;;  %v916_v60 = vsub.f32 %v1803_v13, %v1912_v52  ;;  %v911_v20 = vsub.f32 %v1785_v4, %v1912_v52 }
 0x238   : > { %1479 = vpow2.f32 %v977_v34  ;;  %v957_v10 = vmul.f32 1.442695, %v915_v58  ;;  %v912_v22 = vsub.f32 %v1791_v7, %v1912_v52  ;;  %v909_v33 = vsub.f32 %v1787_v5, %v1912_v52 }
 0x239   : > { %1481 = vpow2.f32 %v979_v35  ;;  %v959_v9 = vmul.f32 1.442695, %v916_v60  ;;  %v949_v34 = vmul.f32 1.442695, %v911_v20  ;;  %v910_v4 = vsub.f32 %v1793_v8, %v1912_v52 }
 0x23a   : > { %v1955_v43 = vpop.eup %1457  ;;  %1483 = vpow2.f32 %v981_v38  ;;  %v951_v35 = vmul.f32 1.442695, %v912_v22  ;;  %v945_v42 = vmul.f32 1.442695, %v909_v33  ;;  %v908_v5 = vsub.f32 %v1779_v1, %v1912_v52 }
 0x23b   : > { %v1959_v39 = vpop.eup %1459  ;;  %1485 = vpow2.f32 %v983_v40  ;;  %v907_v40 = vsub.f32 %v1775_v63, %v1912_v52  ;;  %v905_v63 = vsub.f32 %v1777_v0, %v1912_v52 }
 0x23c   : > { %v1005_v62 = vpack.c.bf16 %v1959_v39, %v1955_v43  ;;  %v1966_v36 = vpop.eup %1461  ;;  %1487 = vpow2.f32 %v985_v41 }
 0x23d   : > { %v1968_v57 = vpop.eup %1463  ;;  %1489 = vpow2.f32 %v987_v44  ;;  %v947_v44 = vmul.f32 1.442695, %v910_v4  ;;  %v937_v0 = vmul.f32 1.442695, %v905_v63 }
 0x23e   : > { %v1970_v49 = vpop.eup %1465  ;;  %1491 = vpow2.f32 %v989_v47  ;;  %v906_v47 = vsub.f32 %v1781_v2, %v1912_v52 }
 0x23f   : > { %v1468_v53 = vpop.eup %1467  ;;  %1493 = vpow2.f32 %v991_v46  ;;  %v1007_v54 = vpack.c.bf16 %v1970_v49, %v1968_v57  ;;  %v941_v46 = vmul.f32 1.442695, %v907_v40 }
 0x240   : > { %v1470_v56 = vpop.eup %1469  ;;  %1495 = vpow2.f32 %v993_v37  ;;  %v943_v37 = vmul.f32 1.442695, %v908_v5  ;;  %v939_v2 = vmul.f32 1.442695, %v906_v47 }
 0x241   : > { %v1976_v59 = vpop.eup %1471  ;;  %1497 = vpow2.f32 %v997_v48  ;;  %v1008_v61 = vpack.c.bf16 %v1470_v56, %v1468_v53 }
 0x242   : > { %v1980_v3 = vpop.eup %1473  ;;  %1499 = vpow2.f32 %v999_v15 }
 0x243   : > { %v1982_v11 = vpop.eup %1475  ;;  %v1009_v14 = vpack.c.bf16 %v1980_v3, %v1976_v59  ;;  %1501 = vpow2.f32 %v1074_v55  ;;  %v748_v51 = vpop.trf.xlu0 }
 0x244   : > { %v1986_v6 = vpop.eup %1477  ;;  %1503 = vpow2.f32 %v957_v10 }
 0x245   : > { %v1988_v17 = vpop.eup %1479  ;;  %v1010_v13 = vpack.c.bf16 %v1986_v6, %v1982_v11  ;;  %1505 = vpow2.f32 %v959_v9 }
 0x246   : > { %v1992_v21 = vpop.eup %1481  ;;  %1507 = vpow2.f32 %v949_v34 }
 0x247   : > { %v1994_v12 = vpop.eup %1483  ;;  %v1011_v16 = vpack.c.bf16 %v1992_v21, %v1988_v17  ;;  %1509 = vpow2.f32 %v951_v35  ;;  %v749_v55 = vpop.trf.xlu0  ;;  %v1284_v21 = vcombine.low %v1832_v24, %v1832_v24 }
 0x248   : > { %v1998_v19 = vpop.eup %1485 }
 0x249   : > { %v1488_v26 = vpop.eup %1487  ;;  %v1012_v29 = vpack.c.bf16 %v1998_v19, %v1994_v12 }
 0x24a   : > { %v1490_v27 = vpop.eup %1489 }
 0x24b   : > { %v1492_v23 = vpop.eup %1491  ;;  %v1013_v30 = vpack.c.bf16 %v1490_v27, %v1488_v26  ;;  %v750_v12 = vpop.trf.xlu0 }
 0x24c   : > { %v1494_v28 = vpop.eup %1493 }
 0x24d   : > { %v1496_v32 = vpop.eup %1495  ;;  %v1014_v31 = vpack.c.bf16 %v1494_v28, %v1492_v23 }
 0x24e   : > { %v1498_v7 = vpop.eup %1497  ;;  %v1015_v45 = vpack.c.bf16 %v1966_v36, %v1496_v32 }
 0x24f   : > { %v1500_v38 = vpop.eup %1499 }
 0x250   : > { %v1502_v25 = vpop.eup %1501  ;;  %v1016_v41 = vpack.c.bf16 %v1500_v38, %v1498_v7 }
 0x251   : > { %v1076_v8 = vadd.f32 1.0, %v1502_v25  ;;  %v1504_v50 = vpop.eup %1503 }
 0x252   : > { %1314 = vmatprep.subr.bf16.mxu1 %v1016_v41  ;;  %v1506_v53 = vpop.eup %1505 }
 0x253   : > { %1315 = vmatpush3.bf16.msra.mxu1 %v1008_v61  ;;  %1511 = vrcp.f32 %v1076_v8  ;;  %v1006_v36 = vpack.c.bf16 %v1506_v53, %v1504_v50  ;;  %v1508_v57 = vpop.eup %1507 }
 0x254   : > { %1513 = vpow2.f32 %v945_v42  ;;  %1316 = vmatprep.subr.bf16.mxu1 %v1015_v45  ;;  %v1510_v49 = vpop.eup %1509 }
 0x255   : > { %1515 = vpow2.f32 %v947_v44  ;;  %v1004_v61 = vpack.c.bf16 %v1510_v49, %v1508_v57 }
 0x256   : > { %1517 = vpow2.f32 %v941_v46 }
 0x257   : > { %1317 = vmatpush3.bf16.msra.mxu1 %v1007_v54  ;;  %1519 = vpow2.f32 %v943_v37 }
 0x258   : > { %1318 = vmatprep.subr.bf16.mxu1 %v1014_v31  ;;  %1521 = vpow2.f32 %v937_v0 }
 0x259   : > { %1523 = vpow2.f32 %v939_v2 }
 0x25b   : > { %1319 = vmatpush3.bf16.msra.mxu1 %v1006_v36 }
 0x25c   : > { %1320 = vmatprep.subr.bf16.mxu1 %v1013_v30 }
 0x25f   : > { %1321 = vmatpush3.bf16.msra.mxu1 %v1005_v62 }
 0x260   : > { %v1512_v54 = vpop.eup %1511  ;;  %1322 = vmatprep.subr.bf16.mxu1 %v1012_v29 }
 0x261   : > { %v1514_v60 = vpop.eup %1513  ;;  %1081 = vst [vmem:[%s1910_s13 + $0x5] sm:$0x1] %v1512_v54 }
 0x262   : > { %v1516_v10 = vpop.eup %1515 }
 0x263   : > { %v764_v1 = vpop.trf.xlu1  ;;  %1323 = vmatpush3.bf16.msra.mxu1 %v1004_v61  ;;  %v1518_v9 = vpop.eup %1517  ;;  %v1003_v20 = vpack.c.bf16 %v1516_v10, %v1514_v60 }
 0x264   : > { %v1268_v48 = vcombine.low %v748_v51, %v764_v1  ;;  %v1269_v15 = vcombine.high %v748_v51, %v764_v1  ;;  %1324 = vmatprep.subr.bf16.mxu1 %v1011_v16  ;;  %v1520_v26 = vpop.eup %1519  ;;  %v751_v16 = vpop.trf.xlu0 }
 0x265   : > { %v1522_v43 = vpop.eup %1521  ;;  %v1002_v39 = vpack.c.bf16 %v1520_v26, %v1518_v9 }
 0x266   : > { %852 = vst [vmem:[%s2025_s16] sm:$0xff] %v1268_v48  ;;  %853 = vst [vmem:[%s2025_s16 + $0x8] sm:$0xff] %v1269_v15  ;;  %v1524_v62 = vpop.eup %1523 }
 0x267   : > { %v765_v52 = vpop.trf.xlu1  ;;  %1325 = vmatpush3.bf16.msra.mxu1 %v1003_v20  ;;  %v1001_v17 = vpack.c.bf16 %v1524_v62, %v1522_v43 }
 0x268   : > { %v1270_v56 = vcombine.low %v749_v55, %v765_v52  ;;  %v1271_v58 = vcombine.high %v749_v55, %v765_v52  ;;  %1326 = vmatprep.subr.bf16.mxu1 %v1010_v13  ;;  %v752_v19 = vpop.trf.xlu0 }
 0x26a   : > { %854 = vst [vmem:[%s2025_s16 + $0x10] sm:$0xff] %v1270_v56  ;;  %855 = vst [vmem:[%s2025_s16 + $0x18] sm:$0xff] %v1271_v58 }
 0x26b   : > { %1327 = vmatpush3.bf16.msra.mxu1 %v1002_v39  ;;  %v766_v11 = vpop.trf.xlu1 }
 0x26c   : > { %1328 = vmatprep.subr.bf16.mxu1 %v1009_v14  ;;  %v1272_v6 = vcombine.low %v750_v12, %v766_v11  ;;  %v1273_v13 = vcombine.high %v750_v12, %v766_v11  ;;  %v753_v27 = vpop.trf.xlu0 }
 0x26e   : > { %856 = vst [vmem:[%s2025_s16 + $0x20] sm:$0xff] %v1272_v6  ;;  %857 = vst [vmem:[%s2025_s16 + $0x28] sm:$0xff] %v1273_v13 }
 0x26f   : > { %1329 = vmatpush3.bf16.msra.mxu1 %v1001_v17  ;;  %v767_v59 = vpop.trf.xlu1 }
 0x270   : > { %v1274_v3 = vcombine.low %v751_v16, %v767_v59  ;;  %v1275_v14 = vcombine.high %v751_v16, %v767_v59  ;;  %v754_v33 = vpop.trf.xlu0 }
 0x272   : > { %1058 = vmatmul.mubr.bf16.vlgmr.msra.gmra.mxu1 %v1284_v21  ;;  %858 = vst [vmem:[%s2025_s16 + $0x30] sm:$0xff] %v1274_v3  ;;  %859 = vst [vmem:[%s2025_s16 + $0x38] sm:$0xff] %v1275_v14 }
 0x273   : > { %v768_v24 = vpop.trf.xlu1 }
 0x274   : > { %v1276_v22 = vcombine.low %v752_v19, %v768_v24  ;;  %v1277_v29 = vcombine.high %v752_v19, %v768_v24  ;;  %v755_v35 = vpop.trf.xlu0 }
 0x276   : > { %860 = vst [vmem:[%s2025_s16 + $0x40] sm:$0xff] %v1276_v22  ;;  %861 = vst [vmem:[%s2025_s16 + $0x48] sm:$0xff] %v1277_v29 }
 0x277   : > { %v769_v23 = vpop.trf.xlu1 }
 0x278   : > { %v1278_v30 = vcombine.low %v753_v27, %v769_v23  ;;  %v1279_v28 = vcombine.high %v753_v27, %v769_v23 }
 0x27a   : > { %862 = vst [vmem:[%s2025_s16 + $0x50] sm:$0xff] %v1278_v30  ;;  %863 = vst [vmem:[%s2025_s16 + $0x58] sm:$0xff] %v1279_v28 }
 0x27b   : > { %v770_v34 = vpop.trf.xlu1 }
 0x27c   : > { %v1280_v32 = vcombine.low %v754_v33, %v770_v34  ;;  %v1281_v4 = vcombine.high %v754_v33, %v770_v34 }
 0x27e   : > { %864 = vst [vmem:[%s2025_s16 + $0x60] sm:$0xff] %v1280_v32  ;;  %865 = vst [vmem:[%s2025_s16 + $0x68] sm:$0xff] %v1281_v4 }
 0x27f   : > { %v771_v31 = vpop.trf.xlu1 }
 0x280   : > { %v1282_v7 = vcombine.low %v755_v35, %v771_v31  ;;  %v1283_v38 = vcombine.high %v755_v35, %v771_v31 }
 0x282   : > { %866 = vst [vmem:[%s2025_s16 + $0x70] sm:$0xff] %v1282_v7  ;;  %867 = vst [vmem:[%s2025_s16 + $0x78] sm:$0xff] %v1283_v38  ;;  %s1531_s16 = sshll.u32 %s1624_s15, 4  ;;  %s1532_s16 = int_to_ptr.vmem [resolvable:$false] %s1531_s16 }
 0x283   : > { %s1533_s17 = scalar_lea.vmem %s1532_s16, 4096  ;;  %p1534_p4 = scmp.lt.s32.totalorder %s2069_s8, %s1532_s16 }
 0x284   : > { %p1535_p5 = scmp.lt.s32.totalorder %s1533_s17, %s1527_s22 }
 0x286   : > { %p1536_p6 = por %p1535_p5, %p1534_p4 }
 0x288   : > { %p1537_p7 = pnand %p1536_p6, %p1530_p2 }
 0x28a   : > { %1540 = shalt.err (!%p1537_p7)
}
 0x28b   : > { %s1541_s14 = scalar_lea.hbm %s2067_s12, 2048  ;;  %s1545_s30 = scalar_lea.hbm %s2131_s4, 8192 }
 0x28c   : > { %p1542_p9 = scmp.ne.s32.totalorder %s2067_s12, %s1541_s14  ;;  %p1546_p12 = scmp.lt.s32.totalorder %s2067_s12, %s2131_s4 }
 0x28d   : > { %p1547_p13 = scmp.lt.s32.totalorder %s1545_s30, %s1541_s14 }
 0x28e   : > { %p1543_p10 = pnand %p1542_p9, %p1708_p3 }
 0x28f   : > { %p1548_p0 = por %p1547_p13, %p1546_p12 }
 0x290   : > { %p1544_p11 = pneg %p1543_p10 }
 0x292   : > { %p1549_p1 = pnand %p1548_p0, %p1544_p11 }
 0x294   : > { %1552 = shalt.err (!%p1549_p1)
}
 0x295   : > { %s1625_s22 = smov 128   ;;  %s1626_s15 = smov 8  }
 0x296   : > { %1372 = dma.vmem_to_hbm [thread:$0]  (%p1708_p3), %s2069_s8, 2048, %s2067_s12, %s2073_s21, %s1625_s22, %s1625_s22, %s1626_s15  }
 0x332   : > { %v1330_v25 = vpop.f32.mrf.mxu1 }
 0x334   : > { %v1331_v40 = vpop.f32.mrf.mxu1 }
 0x335   : > { %v1332_v42 = vadd.f32 %v1331_v40, %v1330_v25 }
 0x336   : > { %v1333_v41 = vpop.f32.mrf.mxu1 }
 0x337   : > { %1525 = vrcp.f32 %v1332_v42 }
 0x338   : > { %v1334_v51 = vpop.f32.mrf.mxu1 }
 0x344   : > { %v1526_v5 = vpop.eup %1525 }
 0x345   : > { %v1069_v44 = vrot.slane %v1526_v5, %v1750_v18 }
 0x347   : > { %v1070_v8 = vmul.f32 %v1332_v42, %v1069_v44 }
 0x349   : > { %v1286_v45 = vclamps-f32 %v1070_v8, 1.0  ;;  %1078 = vst [vmem:[%s1910_s13] sm:$0x3] %v1070_v8 }
 0x34b   : > { %1080 = vst [vmem:[%s1910_s13 + $0x3] sm:$0x3] %v1286_v45 }
 0x34c PF: > { %p1378_p2 = scmp.ge.s32.totalorder %s1619_s25, 2  ;;  %s1125_s6 = sand.u32 1, %s1591_s18  }
 0x34d   : > { %s1126_s8 = scalar_lea.sflag [#allocation3], %s1125_s6 }
 0x34e   : > { %p1375_p3 = pnand %p1378_p2, %p1717_p8 }
 0x350   : > { %p1376_p4 = pneg %p1375_p3 }
 0x352   : > { %1586 = dma.done.wait (%p1376_p4), %s1126_s8, 2048  }
 0x353   : > { %1588 = vsyncadd (%p1376_p4), %s1126_s8, 4294965248  ;;  %s19_s25 = sadd.s32 1, %s1619_s25   ;;  %s2135_s18 = smov %s1595_s19 }
 0x354   : > { %p16_p5 = scmp.ge.s32.totalorder %s19_s25, 6   ;;  %s2136_s19 = smov %s1599_s20 }
 0x355   : > { %s2137_s20 = smov %s1726_s11  ;;  %s2138_s21 = smov %s1611_s23 }
 0x356   : > { %s2139_s22 = smov %s1615_s24  ;;  %s2140_s23 = smov %s2143_s28 }
 0x357   : > { %s2141_s24 = smov %s2147_s29  ;;  %18 = sbr.rel (!%p16_p5) target bundleno = 5 (0x5), region = 86 }
 0x35c   :  { %1142 = vsyncpa [#allocation3], 1 }
 0x35d   :  { %1144 = vsyncpa [#allocation3 + $0x1], 1 }

</bundles_post_ra>
